<compile_context>
chip_gen: v7x
topology: tpu7x:2x2x1
jax: 0.10.0
libtpu: 0.0.40
codegen_flags: <defaults>
</compile_context>

<pallas_src>
import numpy as np

import jax
import jax.numpy as jnp
from jax import lax
from jax.experimental import pallas as pl
from jax.experimental.pallas import tpu as pltpu

_LANES = 128       # lane width of one f32 vreg
_NORM_ROWS = 8     # one f32 vreg of normals -> supports batch_size <= 8
_UNIF_ROWS = 8     # up to 8 modalities, each dim <= 128

_SALT_FORWARD = 0
_SALT_ATTN = 1
_SALT_IMPORTANCE = 2

_SQRT2 = 1.4142135623730951

# In-kernel hardware PRNG on real TPUs; host threefry bits otherwise
# (pltpu.prng_seed has no CPU / interpret lowering).
_ON_TPU = jax.default_backend() == "tpu"

_SMEM_SPEC = pl.BlockSpec(memory_space=pltpu.MemorySpace.SMEM)
_VMEM_SPEC = pl.BlockSpec(memory_space=pltpu.MemorySpace.VMEM)


# ----------------------------- transforms -----------------------------------

def _bits_to_uniform(bits):
    """32-bit random bits (any signedness) -> uniform float32 in [0, 1)."""
    if bits.dtype != jnp.uint32:
        bits = lax.bitcast_convert_type(bits, jnp.uint32)
    mant = (bits & jnp.uint32(0x007FFFFF)) | jnp.uint32(0x3F800000)   # [1, 2)
    return lax.bitcast_convert_type(mant, jnp.float32) - 1.0          # [0, 1)


def _poly(w, coeffs):
    p = jnp.float32(coeffs[0])
    for c in coeffs[1:]:
        p = p * w + jnp.float32(c)
    return p


def _erfinv(x):
    """Single-precision erfinv (Giles 2010): log/sqrt/FMA/where only, all f32."""
    w = -jnp.log((1.0 - x) * (1.0 + x))
    # central branch (w < 5)
    pc = _poly(
        w - 2.5,
        (2.81022636e-08, 3.43273939e-07, -3.5233877e-06, -4.39150654e-06,
         0.00021858087, -0.00125372503, -0.00417768164, 0.246640727,
         1.50140941),
    )
    # tail branch (w >= 5)
    pt = _poly(
        jnp.sqrt(w) - 3.0,
        (-0.000200214257, 0.000100950558, 0.00134934322, -0.00367342844,
         0.00573950773, -0.0076224613, 0.00943887047, 1.00167406,
         2.83297682),
    )
    return jnp.where(w < 5.0, pc, pt) * x


def _normal_from_bits(bits):
    """Random bits -> N(0,1) via inverse CDF: z = sqrt(2) * erfinv(2u - 1)."""
    u = _bits_to_uniform(bits)
    x = jnp.clip(2.0 * u - 1.0, -0.9999997, 0.9999997)   # keep log() finite
    return jnp.float32(_SQRT2) * _erfinv(x)


# ----------------------- TPU kernels (in-kernel PRNG) ------------------------
# Input-free on the data side: only a salted int32 seed vector lives in SMEM,
# so there are no HBM->VMEM input DMAs at all.

def _normal_kernel_prng(seed_ref, norm_ref):
    pltpu.prng_seed(seed_ref[0])
    norm_ref[...] = _normal_from_bits(pltpu.prng_random_bits(norm_ref.shape))


def _uniform_kernel_prng(seed_ref, unif_ref):
    pltpu.prng_seed(seed_ref[0])
    unif_ref[...] = _bits_to_uniform(pltpu.prng_random_bits(unif_ref.shape))


def _fused_kernel_prng(seeds_ref, norm_ref, unif_ref):
    """seeds_ref: (3,) int32 in SMEM = [forward, attention, importance].

    Emits the forward normal tile plus BOTH uniform streams (stacked along
    sublanes) in a single dispatch.  Re-seeding per stream keeps each purpose's
    stream identical to the standalone entry points.
    """
    pltpu.prng_seed(seeds_ref[0])
    norm_ref[...] = _normal_from_bits(pltpu.prng_random_bits(norm_ref.shape))
    pltpu.prng_seed(seeds_ref[1])
    unif_ref[0:_UNIF_ROWS, :] = _bits_to_uniform(
        pltpu.prng_random_bits((_UNIF_ROWS, _LANES)))
    pltpu.prng_seed(seeds_ref[2])
    unif_ref[_UNIF_ROWS:2 * _UNIF_ROWS, :] = _bits_to_uniform(
        pltpu.prng_random_bits((_UNIF_ROWS, _LANES)))


# ------------------ fallback kernels (non-TPU / interpret) -------------------

def _normal_kernel_bits(bits_ref, norm_ref):
    norm_ref[...] = _normal_from_bits(bits_ref[...])


def _uniform_kernel_bits(bits_ref, unif_ref):
    unif_ref[...] = _bits_to_uniform(bits_ref[...])


def _fused_kernel_bits(nbits_ref, ubits_ref, norm_ref, unif_ref):
    norm_ref[...] = _normal_from_bits(nbits_ref[...])
    unif_ref[...] = _bits_to_uniform(ubits_ref[...])


# ----------------------------- jitted impls ----------------------------------

@jax.jit
def _forward_tile(seed_arr):
    """(8,128) f32 standard normals from one salted int32 seed."""
    out_shape = jax.ShapeDtypeStruct((_NORM_ROWS, _LANES), jnp.float32)
    if _ON_TPU:
        return pl.pallas_call(
            _normal_kernel_prng, out_shape=out_shape,
            in_specs=[_SMEM_SPEC], out_specs=_VMEM_SPEC,
        )(seed_arr)
    bits = jax.random.bits(jax.random.PRNGKey(seed_arr[0]),
                           (_NORM_ROWS, _LANES), jnp.uint32)
    return pl.pallas_call(
        _normal_kernel_bits, out_shape=out_shape,
        in_specs=[_VMEM_SPEC], out_specs=_VMEM_SPEC,
    )(bits)


@jax.jit
def _uniform_tile(seed_arr):
    """(8,128) f32 uniforms in [0,1) from one salted int32 seed."""
    out_shape = jax.ShapeDtypeStruct((_UNIF_ROWS, _LANES), jnp.float32)
    if _ON_TPU:
        return pl.pallas_call(
            _uniform_kernel_prng, out_shape=out_shape,
            in_specs=[_SMEM_SPEC], out_specs=_VMEM_SPEC,
        )(seed_arr)
    bits = jax.random.bits(jax.random.PRNGKey(seed_arr[0]),
                           (_UNIF_ROWS, _LANES), jnp.uint32)
    return pl.pallas_call(
        _uniform_kernel_bits, out_shape=out_shape,
        in_specs=[_VMEM_SPEC], out_specs=_VMEM_SPEC,
    )(bits)


@jax.jit
def _fused_tiles(seeds_arr):
    """ONE pallas_call -> ((8,128) normals, (16,128) uniforms [attn; importance])."""
    out_shape = (jax.ShapeDtypeStruct((_NORM_ROWS, _LANES), jnp.float32),
                 jax.ShapeDtypeStruct((2 * _UNIF_ROWS, _LANES), jnp.float32))
    if _ON_TPU:
        return pl.pallas_call(
            _fused_kernel_prng, out_shape=out_shape,
            in_specs=[_SMEM_SPEC], out_specs=(_VMEM_SPEC, _VMEM_SPEC),
        )(seeds_arr)
    k0 = jax.random.PRNGKey(seeds_arr[0])
    k1 = jax.random.PRNGKey(seeds_arr[1])
    k2 = jax.random.PRNGKey(seeds_arr[2])
    nbits = jax.random.bits(k0, (_NORM_ROWS, _LANES), jnp.uint32)
    ubits = jnp.concatenate(
        [jax.random.bits(k1, (_UNIF_ROWS, _LANES), jnp.uint32),
         jax.random.bits(k2, (_UNIF_ROWS, _LANES), jnp.uint32)], axis=0)
    return pl.pallas_call(
        _fused_kernel_bits, out_shape=out_shape,
        in_specs=[_VMEM_SPEC, _VMEM_SPEC], out_specs=(_VMEM_SPEC, _VMEM_SPEC),
    )(nbits, ubits)


# ------------------------------ seed salting ---------------------------------

def _mixed_seed(seed, salt):
    """Pre-mix (user seed, purpose salt) into one positive int32 on the host so
    the jit graph carries no fold_in / split / bits HLOs ahead of the kernel."""
    return (int(seed) * 1000003 + int(salt) * 7919 + 0x5BD1E99) & 0x7FFFFFFF


def _seed_arr(seed, salt):
    return jnp.array([_mixed_seed(seed, salt)], dtype=jnp.int32)


# ------------------------------- public API ----------------------------------

def mock_model_forward(batch, seed=0):
    """Equivalent of MockModel.forward: (batch_size, 2) ~ N(0, 1)."""
    # TODO(synk): torch.randn's exact bit stream is not reproducible; this is
    # distributionally-equivalent standard-normal sampling.
    batch_size = next(iter(batch.values())).shape[0]
    # TODO(synk): for batch_size > 8 add a 1-D sublane grid with
    # dimension_semantics=("parallel",) so v7x's two TensorCores split it.
    assert batch_size <= _NORM_ROWS
    tile = _forward_tile(_seed_arr(seed, _SALT_FORWARD))
    return tile[:batch_size, :2]


def _uniform_dict(feature_dims, seed, salt):
    dims = tuple(feature_dims.values())
    # TODO(synk): tile lanes / add a parallel grid for dim > 128 or > 8 modalities.
    assert len(dims) <= _UNIF_ROWS and all(d <= _LANES for d in dims)
    tile = np.asarray(_uniform_tile(_seed_arr(seed, salt)))   # one lane-dense tile
    return {m: tile[i, :d] for i, (m, d) in enumerate(feature_dims.items())}


def get_attention_weights(feature_dims, seed=1):
    """Equivalent of MockModel.get_attention_weights: {modality: U[0,1)^dim}."""
    return _uniform_dict(feature_dims, seed, _SALT_ATTN)


def get_feature_importance(feature_dims, seed=101):
    """Equivalent of MockModel.get_feature_importance: {modality: U[0,1)^dim}."""
    return _uniform_dict(feature_dims, seed, _SALT_IMPORTANCE)


def mock_model_outputs(batch, feature_dims, seed_forward=0, seed_attn=1,
                       seed_importance=101):
    """Fused path: forward + attention + importance in ONE pallas_call."""
    batch_size = next(iter(batch.values())).shape[0]
    dims = tuple(feature_dims.values())
    assert batch_size <= _NORM_ROWS
    assert len(dims) <= _UNIF_ROWS and all(d <= _LANES for d in dims)
    seeds = jnp.array([_mixed_seed(seed_forward, _SALT_FORWARD),
                       _mixed_seed(seed_attn, _SALT_ATTN),
                       _mixed_seed(seed_importance, _SALT_IMPORTANCE)],
                      dtype=jnp.int32)
    norm_tile, unif_tile = _fused_tiles(seeds)
    unif = np.asarray(unif_tile)
    attn = {m: unif[i, :d] for i, (m, d) in enumerate(feature_dims.items())}
    imp = {m: unif[_UNIF_ROWS + i, :d]
           for i, (m, d) in enumerate(feature_dims.items())}
    return norm_tile[:batch_size, :2], attn, imp


# ---------------------------------- demo -------------------------------------

if __name__ == "__main__":
    # feature_dims fixture from the test file
    feature_dims = {"images": 64, "sequences": 128, "clinical": 20}

    key = jax.random.PRNGKey(0)
    k_img, k_seq, k_cli = jax.random.split(key, 3)
    B = 2
    batch = {
        "images": jax.random.normal(k_img, (B, feature_dims["images"]), jnp.float32),
        "sequences": jax.random.normal(k_seq, (B, feature_dims["sequences"]), jnp.float32),
        "clinical": jax.random.normal(k_cli, (B, feature_dims["clinical"]), jnp.float32),
    }

    # Fused path: all three model outputs from a single kernel dispatch.
    fwd, attn, imp = mock_model_outputs(batch, feature_dims,
                                        seed_forward=0, seed_attn=1,
                                        seed_importance=101)
    jax.block_until_ready(fwd)
    assert fwd.shape == (B, 2) and fwd.dtype == jnp.float32
    assert bool(jnp.all(jnp.isfinite(fwd)))
    for m, d in feature_dims.items():
        assert attn[m].shape == (d,) and imp[m].shape == (d,)
        assert bool(jnp.all((attn[m] >= 0.0) & (attn[m] < 1.0)))
        assert bool(jnp.all((imp[m] >= 0.0) & (imp[m] < 1.0)))
    assert not bool(jnp.allclose(attn["sequences"], imp["sequences"]))

    # Standalone (per-method, specialized-kernel) paths.
    out = mock_model_forward(batch, seed=0)
    jax.block_until_ready(out)
    assert out.shape == (B, 2) and bool(jnp.all(jnp.isfinite(out)))

    a7 = get_attention_weights(feature_dims, seed=7)
    i7 = get_feature_importance(feature_dims, seed=7)
    for m, d in feature_dims.items():
        assert a7[m].shape == (d,) and i7[m].shape == (d,)
        assert bool(jnp.all((a7[m] >= 0.0) & (a7[m] < 1.0)))
        assert bool(jnp.all((i7[m] >= 0.0) & (i7[m] < 1.0)))
    # salted streams: equal user seed must still give distinct purposes
    assert not bool(jnp.allclose(a7["images"], i7["images"]))

    print("KERNEL_OK")
</pallas_src>

<mosaic_0001>
module attributes {stable_mosaic.version = 11 : i64} {
  func.func @_fused_kernel_bits(%arg0: memref<8x128xi32, #tpu.memory_space<vmem>>, %arg1: memref<16x128xi32, #tpu.memory_space<vmem>>, %arg2: memref<8x128xf32, #tpu.memory_space<vmem>>, %arg3: memref<16x128xf32, #tpu.memory_space<vmem>>) attributes {dimension_semantics = [], scalar_prefetch = 0 : i64, scratch_operands = 0 : i64, tpu.core_type = #tpu.core_type<tc>} {
    %c0 = arith.constant 0 : index
    %c0_0 = arith.constant 0 : index
    %0 = vector.load %arg0[%c0, %c0_0] : memref<8x128xi32, #tpu.memory_space<vmem>>, vector<8x128xi32>
    %c8388607_i32 = arith.constant 8388607 : i32
    %1 = vector.broadcast %c8388607_i32 : i32 to vector<8x128xi32>
    %2 = arith.andi %0, %1 : vector<8x128xi32>
    %c1065353216_i32 = arith.constant 1065353216 : i32
    %3 = vector.broadcast %c1065353216_i32 : i32 to vector<8x128xi32>
    %4 = arith.ori %2, %3 : vector<8x128xi32>
    %5 = tpu.bitcast %4 : vector<8x128xi32> -> vector<8x128xf32>
    %cst = arith.constant 1.000000e+00 : f32
    %6 = vector.broadcast %cst : f32 to vector<8x128xf32>
    %7 = arith.subf %5, %6 : vector<8x128xf32>
    %cst_1 = arith.constant 2.000000e+00 : f32
    %8 = vector.broadcast %cst_1 : f32 to vector<8x128xf32>
    %9 = arith.mulf %8, %7 : vector<8x128xf32>
    %cst_2 = arith.constant 1.000000e+00 : f32
    %10 = vector.broadcast %cst_2 : f32 to vector<8x128xf32>
    %11 = arith.subf %9, %10 : vector<8x128xf32>
    %cst_3 = arith.constant -0.999999701 : f32
    %cst_4 = arith.constant 0.999999701 : f32
    %12 = vector.broadcast %cst_3 : f32 to vector<8x128xf32>
    %13 = arith.maximumf %12, %11 : vector<8x128xf32>
    %14 = vector.broadcast %cst_4 : f32 to vector<8x128xf32>
    %15 = arith.minimumf %14, %13 : vector<8x128xf32>
    %cst_5 = arith.constant 1.000000e+00 : f32
    %16 = vector.broadcast %cst_5 : f32 to vector<8x128xf32>
    %17 = arith.subf %16, %15 : vector<8x128xf32>
    %cst_6 = arith.constant 1.000000e+00 : f32
    %18 = vector.broadcast %cst_6 : f32 to vector<8x128xf32>
    %19 = arith.addf %18, %15 : vector<8x128xf32>
    %20 = arith.mulf %17, %19 : vector<8x128xf32>
    %21 = math.log %20 : vector<8x128xf32>
    %cst_7 = arith.constant 0.000000e+00 : f32
    %22 = vector.broadcast %cst_7 : f32 to vector<8x128xf32>
    %23 = arith.subf %22, %21 : vector<8x128xf32>
    %cst_8 = arith.constant 2.500000e+00 : f32
    %24 = vector.broadcast %cst_8 : f32 to vector<8x128xf32>
    %25 = arith.subf %23, %24 : vector<8x128xf32>
    %cst_9 = arith.constant 2.81022636E-8 : f32
    %26 = vector.broadcast %cst_9 : f32 to vector<8x128xf32>
    %27 = arith.mulf %26, %25 : vector<8x128xf32>
    %cst_10 = arith.constant 3.43273939E-7 : f32
    %28 = vector.broadcast %cst_10 : f32 to vector<8x128xf32>
    %29 = arith.addf %27, %28 : vector<8x128xf32>
    %30 = arith.mulf %29, %25 : vector<8x128xf32>
    %cst_11 = arith.constant -3.5233877E-6 : f32
    %31 = vector.broadcast %cst_11 : f32 to vector<8x128xf32>
    %32 = arith.addf %30, %31 : vector<8x128xf32>
    %33 = arith.mulf %32, %25 : vector<8x128xf32>
    %cst_12 = arith.constant -4.39150654E-6 : f32
    %34 = vector.broadcast %cst_12 : f32 to vector<8x128xf32>
    %35 = arith.addf %33, %34 : vector<8x128xf32>
    %36 = arith.mulf %35, %25 : vector<8x128xf32>
    %cst_13 = arith.constant 2.1858087E-4 : f32
    %37 = vector.broadcast %cst_13 : f32 to vector<8x128xf32>
    %38 = arith.addf %36, %37 : vector<8x128xf32>
    %39 = arith.mulf %38, %25 : vector<8x128xf32>
    %cst_14 = arith.constant -0.00125372503 : f32
    %40 = vector.broadcast %cst_14 : f32 to vector<8x128xf32>
    %41 = arith.addf %39, %40 : vector<8x128xf32>
    %42 = arith.mulf %41, %25 : vector<8x128xf32>
    %cst_15 = arith.constant -0.00417768164 : f32
    %43 = vector.broadcast %cst_15 : f32 to vector<8x128xf32>
    %44 = arith.addf %42, %43 : vector<8x128xf32>
    %45 = arith.mulf %44, %25 : vector<8x128xf32>
    %cst_16 = arith.constant 0.246640727 : f32
    %46 = vector.broadcast %cst_16 : f32 to vector<8x128xf32>
    %47 = arith.addf %45, %46 : vector<8x128xf32>
    %48 = arith.mulf %47, %25 : vector<8x128xf32>
    %cst_17 = arith.constant 1.50140941 : f32
    %49 = vector.broadcast %cst_17 : f32 to vector<8x128xf32>
    %50 = arith.addf %48, %49 : vector<8x128xf32>
    %51 = math.sqrt %23 : vector<8x128xf32>
    %cst_18 = arith.constant 3.000000e+00 : f32
    %52 = vector.broadcast %cst_18 : f32 to vector<8x128xf32>
    %53 = arith.subf %51, %52 : vector<8x128xf32>
    %cst_19 = arith.constant -2.00214257E-4 : f32
    %54 = vector.broadcast %cst_19 : f32 to vector<8x128xf32>
    %55 = arith.mulf %54, %53 : vector<8x128xf32>
    %cst_20 = arith.constant 1.00950558E-4 : f32
    %56 = vector.broadcast %cst_20 : f32 to vector<8x128xf32>
    %57 = arith.addf %55, %56 : vector<8x128xf32>
    %58 = arith.mulf %57, %53 : vector<8x128xf32>
    %cst_21 = arith.constant 0.00134934322 : f32
    %59 = vector.broadcast %cst_21 : f32 to vector<8x128xf32>
    %60 = arith.addf %58, %59 : vector<8x128xf32>
    %61 = arith.mulf %60, %53 : vector<8x128xf32>
    %cst_22 = arith.constant -0.00367342844 : f32
    %62 = vector.broadcast %cst_22 : f32 to vector<8x128xf32>
    %63 = arith.addf %61, %62 : vector<8x128xf32>
    %64 = arith.mulf %63, %53 : vector<8x128xf32>
    %cst_23 = arith.constant 0.00573950773 : f32
    %65 = vector.broadcast %cst_23 : f32 to vector<8x128xf32>
    %66 = arith.addf %64, %65 : vector<8x128xf32>
    %67 = arith.mulf %66, %53 : vector<8x128xf32>
    %cst_24 = arith.constant -0.0076224613 : f32
    %68 = vector.broadcast %cst_24 : f32 to vector<8x128xf32>
    %69 = arith.addf %67, %68 : vector<8x128xf32>
    %70 = arith.mulf %69, %53 : vector<8x128xf32>
    %cst_25 = arith.constant 0.00943887047 : f32
    %71 = vector.broadcast %cst_25 : f32 to vector<8x128xf32>
    %72 = arith.addf %70, %71 : vector<8x128xf32>
    %73 = arith.mulf %72, %53 : vector<8x128xf32>
    %cst_26 = arith.constant 1.00167406 : f32
    %74 = vector.broadcast %cst_26 : f32 to vector<8x128xf32>
    %75 = arith.addf %73, %74 : vector<8x128xf32>
    %76 = arith.mulf %75, %53 : vector<8x128xf32>
    %cst_27 = arith.constant 2.83297682 : f32
    %77 = vector.broadcast %cst_27 : f32 to vector<8x128xf32>
    %78 = arith.addf %76, %77 : vector<8x128xf32>
    %cst_28 = arith.constant 5.000000e+00 : f32
    %79 = vector.broadcast %cst_28 : f32 to vector<8x128xf32>
    %80 = arith.cmpf olt, %23, %79 : vector<8x128xf32>
    %81 = arith.select %80, %50, %78 : vector<8x128xi1>, vector<8x128xf32>
    %82 = arith.mulf %81, %15 : vector<8x128xf32>
    %cst_29 = arith.constant 1.41421354 : f32
    %83 = vector.broadcast %cst_29 : f32 to vector<8x128xf32>
    %84 = arith.mulf %83, %82 : vector<8x128xf32>
    %c0_30 = arith.constant 0 : index
    %c0_31 = arith.constant 0 : index
    %85 = vector.load %arg2[%c0_30, %c0_31] : memref<8x128xf32, #tpu.memory_space<vmem>>, vector<8x128xf32>
    tpu.vector_store %arg2[%c0_30, %c0_31], %84 {strides = array<i32>} : memref<8x128xf32, #tpu.memory_space<vmem>>, vector<8x128xf32>,
    %c0_32 = arith.constant 0 : index
    %c0_33 = arith.constant 0 : index
    %86 = vector.load %arg1[%c0_32, %c0_33] : memref<16x128xi32, #tpu.memory_space<vmem>>, vector<16x128xi32>
    %c8388607_i32_34 = arith.constant 8388607 : i32
    %87 = vector.broadcast %c8388607_i32_34 : i32 to vector<16x128xi32>
    %88 = arith.andi %86, %87 : vector<16x128xi32>
    %c1065353216_i32_35 = arith.constant 1065353216 : i32
    %89 = vector.broadcast %c1065353216_i32_35 : i32 to vector<16x128xi32>
    %90 = arith.ori %88, %89 : vector<16x128xi32>
    %91 = tpu.bitcast %90 : vector<16x128xi32> -> vector<16x128xf32>
    %cst_36 = arith.constant 1.000000e+00 : f32
    %92 = vector.broadcast %cst_36 : f32 to vector<16x128xf32>
    %93 = arith.subf %91, %92 : vector<16x128xf32>
    %c0_37 = arith.constant 0 : index
    %c0_38 = arith.constant 0 : index
    %94 = vector.load %arg3[%c0_37, %c0_38] : memref<16x128xf32, #tpu.memory_space<vmem>>, vector<16x128xf32>
    tpu.vector_store %arg3[%c0_37, %c0_38], %93 {strides = array<i32>} : memref<16x128xf32, #tpu.memory_space<vmem>>, vector<16x128xf32>,
    return
  }
}

</mosaic_0001>

<bundles_post_ra>
// kernel: _fused_tiles.13
= control target key start
LH: loop header
LB: loop body
LE: loop exit
PB: predicated region body
PF: predicated region fallthrough
CT: control target
= control target key end

     0   :  { %9 = vsyncpa [#allocation3], 0  ;;  %s238_s0 = inlined_call_operand.vmem [shape: u32[8,128], index: 0, kind: input, shape index: {}]   ;;  %s239_s1 = inlined_call_operand.vmem [shape: u32[16,128], index: 1, kind: input, shape index: {}]   ;;  %s240_s2 = inlined_call_operand.hbm [shape: f32[8,128], index: 2, kind: output, shape index: {0}]   ;;  %s241_s3 = inlined_call_operand.hbm [shape: f32[16,128], index: 3, kind: output, shape index: {1}]  }
   0x1   :  { %v15_v0 = vld [vmem:[%s238_s0] sm:$0xff]  ;;  %v77_v2 = vld [vmem:[%s239_s1 + $0x8] sm:$0xff] }
   0x2   :  { %v76_v1 = vld [vmem:[%s239_s1] sm:$0xff]  ;;  %v16_v3 = vand.u32 8388607, %v15_v0  ;;  %v79_v5 = vand.u32 8388607, %v77_v2 }
   0x3   :  { %v78_v4 = vand.u32 8388607, %v76_v1 }
   0x4   :  { %10 = vsyncpa [#allocation5], 0  ;;  %s181_s18 = smov [#allocation4]   ;;  %v17_v6 = vor.u32 1065353216, %v16_v3  ;;  %v81_v8 = vor.u32 1065353216, %v79_v5 }
   0x5   :  { %s103_s19 = sshll.u32 %s181_s18, 4  ;;  %v80_v7 = vor.u32 1065353216, %v78_v4  ;;  %s104_s19 = int_to_ptr.vmem [resolvable:$true] %s103_s19 }
   0x6   :  { %v118_v9 = vadd.f32 -1.0, %v17_v6  ;;  %v124_v11 = vadd.f32 -1.0, %v81_v8  ;;  %s133_s0 = scalar_lea.vmem %s104_s19, 256  ;;  %p138_p1 = scmp.lt.s32.totalorder %s104_s19, %s104_s19 }
   0x7   :  { %v123_v10 = vadd.f32 -1.0, %v80_v7  ;;  %p134_p0 = scmp.ne.s32.totalorder %s104_s19, %s133_s0  ;;  %p139_p2 = scmp.lt.s32.totalorder %s133_s0, %s133_s0 }
   0x8   :  { %v20_v12 = vmul.f32 2.0, %v118_v9  ;;  %87 = vst [vmem:[#allocation4 + $0x8] sm:$0xff] %v124_v11 }
   0x9   :  { %86 = vst [vmem:[#allocation4] sm:$0xff] %v123_v10  ;;  %p140_p3 = por %p139_p2, %p138_p1 }
   0xb   :  { %p141_p4 = pnand %p140_p3, %p134_p0 }
   0xd   :  { %144 = shalt.err (!%p141_p4)
}
   0xe   :  { %s145_s21 = scalar_lea.hbm %s241_s3, 256 }
   0xf   :  { %p146_p5 = scmp.ne.s32.totalorder %s241_s3, %s145_s21  ;;  %p149_p6 = scmp.lt.u32.totalorder %s145_s21, %s241_s3 }
  0x11   :  { %p151_p7 = pnand %p149_p6, %p146_p5 }
  0x13   :  { %154 = shalt.err (!%p151_p7)
}
  0x14   :  { %s182_s26 = smov 128   ;;  %s183_s27 = smov 8   ;;  %v119_v13 = vadd.f32 -1.0, %v20_v12 }
  0x15   :  { %109 = dma.vmem_to_hbm [thread:$0]  %s104_s19, 256, %s241_s3, [#allocation5], %s182_s26, %s182_s26, %s183_s27  }
  0x16   :  { %v120_v14 = vclamps-f32 %v119_v13, 0.9999997  ;;  %s184_s3 = smov [#allocation2]  }
  0x17   :  { %s94_s30 = sshll.u32 %s184_s3, 4  ;;  %s95_s30 = int_to_ptr.vmem [resolvable:$true] %s94_s30 }
  0x18   :  { %v24_v15 = vsub.f32 1.0, %v120_v14  ;;  %v25_v16 = vadd.f32 1.0, %v120_v14  ;;  %s155_s4 = scalar_lea.vmem %s95_s30, 128  ;;  %p160_p9 = scmp.lt.s32.totalorder %s95_s30, %s95_s30 }
  0x19   :  { %p156_p8 = scmp.ne.s32.totalorder %s95_s30, %s155_s4  ;;  %p161_p10 = scmp.lt.s32.totalorder %s155_s4, %s155_s4 }
  0x1a   :  { %v26_v17 = vmul.f32 %v25_v16, %v24_v15 }
  0x1b   :  { %p162_p11 = por %p161_p10, %p160_p9 }
  0x1c   :  { %129 = vlog2.f32 %v26_v17 }
  0x1d   :  { %p163_p12 = pnand %p162_p11, %p156_p8 }
  0x26   :  { %v130_v18 = vpop.eup %129 }
  0x27   :  { %v28_v19 = vmul.f32 0.6931472, %v130_v18 }
  0x29   :  { %v29_v20 = vsub.f32 0.0, %v28_v19 }
  0x2b   :  { %v121_v21 = vadd.f32 -2.5, %v29_v20  ;;  %131 = vrsqrt.f32 %v29_v20  ;;  %vm49_vm0 = vcmp.eq.f32.partialorder %v29_v20, inf  ;;  %v52_v28 = vand.u32 2147483648, %v29_v20 }
  0x2c   :  { %vm51_vm1 = vcmp.eq.f32.partialorder %v29_v20, 0.0  ;;  %vm71_vm2 = vcmp.lt.f32.partialorder %v29_v20, 5.0 }
  0x2d   :  { %v31_v22 = vmul.f32 2.8102264e-08, %v121_v21 }
  0x2f   :  { %v32_v23 = vadd.f32 3.4327394e-07, %v31_v22 }
  0x31   :  { %v33_v24 = vmul.f32 %v121_v21, %v32_v23 }
  0x33   :  { %v34_v25 = vadd.f32 -3.5233877e-06, %v33_v24 }
  0x35   :  { %v132_v26 = vpop.eup %131  ;;  %v35_v27 = vmul.f32 %v121_v21, %v34_v25 }
  0x36   :  { %v48_v29 = vmul.f32 %v132_v26, %v29_v20 }
  0x37   :  { %v36_v30 = vadd.f32 -4.3915065e-06, %v35_v27 }
  0x38   :  { %v50_v31 = vsel %vm49_vm0, %v29_v20, %v48_v29 }
  0x39   :  { %v37_v32 = vmul.f32 %v121_v21, %v36_v30  ;;  %v53_v33 = vsel %vm51_vm1, %v52_v28, %v50_v31 }
  0x3a   :  { %v122_v34 = vadd.f32 -3.0, %v53_v33 }
  0x3b   :  { %v38_v35 = vadd.f32 0.00021858087, %v37_v32 }
  0x3c   :  { %v55_v36 = vmul.f32 -0.00020021426, %v122_v34 }
  0x3d   :  { %v39_v37 = vmul.f32 %v121_v21, %v38_v35 }
  0x3e   :  { %v56_v38 = vadd.f32 0.00010095056, %v55_v36 }
  0x3f   :  { %v40_v39 = vadd.f32 -0.001253725, %v39_v37 }
  0x40   :  { %v57_v40 = vmul.f32 %v122_v34, %v56_v38 }
  0x41   :  { %v41_v42 = vmul.f32 %v121_v21, %v40_v39 }
  0x42   :  { %v58_v41 = vadd.f32 0.0013493432, %v57_v40 }
  0x43   :  { %v42_v45 = vadd.f32 -0.0041776816, %v41_v42 }
  0x44   :  { %v59_v43 = vmul.f32 %v122_v34, %v58_v41 }
  0x45   :  { %v43_v48 = vmul.f32 %v121_v21, %v42_v45 }
  0x46   :  { %v60_v44 = vadd.f32 -0.0036734284, %v59_v43 }
  0x47   :  { %v44_v51 = vadd.f32 0.24664073, %v43_v48 }
  0x48   :  { %v61_v46 = vmul.f32 %v122_v34, %v60_v44 }
  0x49   :  { %v45_v54 = vmul.f32 %v121_v21, %v44_v51 }
  0x4a   :  { %v62_v47 = vadd.f32 0.0057395077, %v61_v46 }
  0x4b   :  { %v46_v57 = vadd.f32 1.5014094, %v45_v54 }
  0x4c   :  { %v63_v49 = vmul.f32 %v122_v34, %v62_v47 }
  0x4e   :  { %v64_v50 = vadd.f32 -0.0076224613, %v63_v49 }
  0x50   :  { %v65_v52 = vmul.f32 %v122_v34, %v64_v50 }
  0x52   :  { %v66_v53 = vadd.f32 0.0094388705, %v65_v52 }
  0x54   :  { %v67_v55 = vmul.f32 %v122_v34, %v66_v53 }
  0x56   :  { %v68_v56 = vadd.f32 1.001674, %v67_v55 }
  0x58   :  { %v69_v58 = vmul.f32 %v122_v34, %v68_v56 }
  0x5a   :  { %v70_v59 = vadd.f32 2.8329768, %v69_v58 }
  0x5c   :  { %v72_v60 = vsel %vm71_vm2, %v46_v57, %v70_v59 }
  0x5d   :  { %v73_v61 = vmul.f32 %v120_v14, %v72_v60 }
  0x5f   :  { %v74_v62 = vmul.f32 1.4142135, %v73_v61 }
  0x61   :  { %75 = vst [vmem:[#allocation2] sm:$0xff] %v74_v62 }
  0x62   :  { %166 = shalt.err (!%p163_p12)
}
  0x63   :  { %s167_s7 = scalar_lea.hbm %s240_s2, 128 }
  0x64   :  { %p168_p13 = scmp.ne.s32.totalorder %s240_s2, %s167_s7  ;;  %p171_p0 = scmp.lt.u32.totalorder %s167_s7, %s240_s2 }
  0x66   :  { %p173_p1 = pnand %p171_p0, %p168_p13 }
  0x68   :  { %176 = shalt.err (!%p173_p1)
}
  0x69   :  { %97 = dma.vmem_to_hbm [thread:$0]  %s95_s30, 128, %s240_s2, [#allocation3]  }
  0x6a   :  { %177 = dma.done.wait [#allocation3], 128  }
  0x6b   :  { %178 = vsyncadd [#allocation3], 4294967168 }
  0x6c   :  { %179 = dma.done.wait [#allocation5], 256  }
  0x6d   :  { %180 = vsyncadd [#allocation5], 4294967040 }
  0x6e   :  { %116 = vsyncpa [#allocation3], 1 }
  0x6f   :  { %117 = vsyncpa [#allocation5], 1 }

</bundles_post_ra>
